<compile_context>
chip_gen: v7x
topology: tpu7x:2x2x1
jax: 0.10.0
libtpu: 0.0.40
codegen_flags: <defaults>
</compile_context>

<pallas_src>
import math

import jax
import jax.numpy as jnp
from jax.experimental import pallas as pl
from jax.experimental.pallas import tpu as pltpu

_INV_SQRT2 = 1.0 / math.sqrt(2.0)
_MiB = 1024 * 1024


def _gelu_exact(h):
    # Exact (erf) GELU in f32, matching torch.nn.GELU() default.
    return 0.5 * h * (1.0 + jax.lax.erf(h * _INV_SQRT2))


def _mlp_kernel_resident(x_ref, w1_ref, b1_ref, w2_ref, b2_ref, o_ref):
    # x_ref:  (tm, D_in_p)    bf16 tile of input rows
    # w1_ref: (D_in_p, H_p)   bf16 full fc1 weight (resident: constant index)
    # b1_ref: (1, H_p)        f32 fc1 bias
    # w2_ref: (H_p, D_out_p)  bf16 full fc2 weight (resident)
    # b2_ref: (1, D_out_p)    f32 fc2 bias
    # o_ref:  (tm, D_out_p)   f32 output tile
    h = jnp.dot(x_ref[...], w1_ref[...], preferred_element_type=jnp.float32)
    h = _gelu_exact(h + b1_ref[...])
    o_ref[...] = (
        jnp.dot(h.astype(jnp.bfloat16), w2_ref[...],
                preferred_element_type=jnp.float32)
        + b2_ref[...]
    ).astype(o_ref.dtype)


def _mlp_kernel_stream(x_ref, w1_ref, b1_ref, w2_ref, b2_ref, o_ref):
    # Hidden dim streamed in blocks of tk; accumulate directly into the
    # resident f32 output tile (its block index is constant across k).
    k = pl.program_id(1)

    @pl.when(k == 0)
    def _init():
        o_ref[...] = jnp.zeros_like(o_ref)

    h = jnp.dot(x_ref[...], w1_ref[...], preferred_element_type=jnp.float32)
    h = _gelu_exact(h + b1_ref[...])
    o_ref[...] += jnp.dot(h.astype(jnp.bfloat16), w2_ref[...],
                          preferred_element_type=jnp.float32)

    @pl.when(k == pl.num_programs(1) - 1)
    def _finalize():
        o_ref[...] += b2_ref[...]


def _round_up(x, m):
    return ((x + m - 1) // m) * m


def _pick_row_tile(M, tm_max):
    """Row tile: multiple of 16 (bf16 sublanes), <= tm_max, <= ~20% pad waste,
    preferring >= 2 row tiles so a 2-TC chip can split the parallel axis."""
    candidates = sorted(
        {c for c in (tm_max, 1024, 512, 256, 128, 64, 32, 16) if 16 <= c <= tm_max},
        reverse=True,
    )
    tm_eff = candidates[-1]
    for cand in candidates:
        pad = _round_up(M, cand) - M
        if pad <= 0.2 * M:
            tm_eff = cand
            break
    while _round_up(M, tm_eff) // tm_eff < 2 and tm_eff >= 32:
        tm_eff //= 2
    return tm_eff


def mlp_forward(x, w1, b1, w2, b2, *, tm=512, tk=512,
                resident_weight_budget_bytes=40 * _MiB):
    """x: (B, S, D_in) f32 -> (B, S, D_out) f32, matching MLP.forward (p=0.0).

    w1: (D_in, H), b1: (H,), w2: (H, D_out), b2: (D_out,)  (pre-transposed
    relative to the PyTorch nn.Linear weight layout)."""
    B, S, D_in = x.shape
    H = w1.shape[1]
    D_out = w2.shape[1]
    M = B * S

    # Lane-pad feature dims to multiples of 128 (lane-dense, no masked vst).
    D_in_p = _round_up(D_in, 128)
    H_p = _round_up(H, 128)
    D_out_p = _round_up(D_out, 128)

    tm_eff = _pick_row_tile(M, tm)
    M_p = _round_up(M, tm_eff)
    n_row_tiles = M_p // tm_eff

    # Conservative VMEM need with fully-resident weights (weights counted
    # double-buffered even though their block index is constant).
    resident_need = (
        2 * tm_eff * D_in_p * 2          # x tiles (bf16, 2 buffers)
        + 2 * D_in_p * H_p * 2           # W1 (bf16)
        + 2 * H_p * D_out_p * 2          # W2 (bf16)
        + 2 * 4 * (H_p + D_out_p)        # biases (f32)
        + 2 * tm_eff * D_out_p * 4       # out tiles (f32, 2 buffers)
        + tm_eff * H_p * 4               # fc1/GELU intermediate (f32)
    )
    use_resident = resident_need <= resident_weight_budget_bytes

    tk_eff = None
    if not use_resident:
        # Largest multiple of 128 that divides H_p and is <= tk; if only a
        # tiny divisor exists, pad H up to a multiple of tk instead (zero
        # padding is exact: GELU(0)=0 and padded W2 rows are 0).
        tk_req = min(tk, H_p)
        tk_eff = 128
        for cand in range(tk_req, 127, -128):
            if H_p % cand == 0:
                tk_eff = cand
                break
        if tk_eff < min(256, tk_req):
            tk_eff = tk_req
            H_p = _round_up(H_p, tk_eff)

    # Pad and cast.  All padding is exact (zeros contribute nothing).
    x2d = x.reshape(M, D_in)
    x_p = jnp.pad(x2d, ((0, M_p - M), (0, D_in_p - D_in))).astype(jnp.bfloat16)
    w1_p = jnp.pad(w1, ((0, D_in_p - D_in), (0, H_p - H))).astype(jnp.bfloat16)
    b1_p = jnp.pad(b1, (0, H_p - H)).reshape(1, H_p).astype(jnp.float32)
    w2_p = jnp.pad(w2, ((0, H_p - H), (0, D_out_p - D_out))).astype(jnp.bfloat16)
    b2_p = jnp.pad(b2, (0, D_out_p - D_out)).reshape(1, D_out_p).astype(jnp.float32)

    flops = 2 * M_p * (D_in_p * H_p + H_p * D_out_p)

    if use_resident:
        bytes_accessed = (
            2 * M_p * D_in_p            # x (bf16), read once
            + 2 * D_in_p * H_p          # W1 (bf16), read once (resident)
            + 2 * H_p * D_out_p         # W2 (bf16), read once (resident)
            + 4 * (H_p + D_out_p)       # biases
            + 4 * M_p * D_out_p         # out (f32)
        )
        vmem_limit = int(min(max(resident_need + 8 * _MiB, 32 * _MiB), 56 * _MiB))
        y_p = pl.pallas_call(
            _mlp_kernel_resident,
            out_shape=jax.ShapeDtypeStruct((M_p, D_out_p), jnp.float32),
            grid_spec=pltpu.PrefetchScalarGridSpec(
                num_scalar_prefetch=0,
                grid=(n_row_tiles,),
                in_specs=[
                    pl.BlockSpec((tm_eff, D_in_p), lambda i: (i, 0)),   # x rows
                    pl.BlockSpec((D_in_p, H_p), lambda i: (0, 0)),      # W1 (resident)
                    pl.BlockSpec((1, H_p), lambda i: (0, 0)),           # b1
                    pl.BlockSpec((H_p, D_out_p), lambda i: (0, 0)),     # W2 (resident)
                    pl.BlockSpec((1, D_out_p), lambda i: (0, 0)),       # b2
                ],
                out_specs=pl.BlockSpec((tm_eff, D_out_p), lambda i: (i, 0)),
            ),
            compiler_params=pltpu.CompilerParams(
                dimension_semantics=("parallel",),
                vmem_limit_bytes=vmem_limit,
            ),
            cost_estimate=pl.CostEstimate(
                flops=flops,
                transcendentals=M_p * H_p,
                bytes_accessed=bytes_accessed,
            ),
        )(x_p, w1_p, b1_p, w2_p, b2_p)
    else:
        n_k_tiles = H_p // tk_eff
        stream_need = (
            2 * tm_eff * D_in_p * 2
            + 2 * D_in_p * tk_eff * 2
            + 2 * tk_eff * D_out_p * 2
            + 2 * 4 * (tk_eff + D_out_p)
            + 2 * tm_eff * D_out_p * 4
            + tm_eff * tk_eff * 4
        )
        vmem_limit = int(min(max(stream_need + 8 * _MiB, 32 * _MiB), 56 * _MiB))
        bytes_accessed = (
            2 * M_p * D_in_p
            + n_row_tiles * 2 * D_in_p * H_p       # W1 re-streamed per row tile
            + n_row_tiles * 2 * H_p * D_out_p      # W2 re-streamed per row tile
            + 4 * (H_p + D_out_p)
            + 4 * M_p * D_out_p
        )
        y_p = pl.pallas_call(
            _mlp_kernel_stream,
            out_shape=jax.ShapeDtypeStruct((M_p, D_out_p), jnp.float32),
            grid_spec=pltpu.PrefetchScalarGridSpec(
                num_scalar_prefetch=0,
                grid=(n_row_tiles, n_k_tiles),
                in_specs=[
                    pl.BlockSpec((tm_eff, D_in_p), lambda i, k: (i, 0)),   # x rows
                    pl.BlockSpec((D_in_p, tk_eff), lambda i, k: (0, k)),   # W1 col-block
                    pl.BlockSpec((1, tk_eff), lambda i, k: (0, k)),        # b1 slice
                    pl.BlockSpec((tk_eff, D_out_p), lambda i, k: (k, 0)),  # W2 row-block
                    pl.BlockSpec((1, D_out_p), lambda i, k: (0, 0)),       # b2
                ],
                out_specs=pl.BlockSpec((tm_eff, D_out_p), lambda i, k: (i, 0)),
            ),
            compiler_params=pltpu.CompilerParams(
                dimension_semantics=("parallel", "arbitrary"),
                vmem_limit_bytes=vmem_limit,
            ),
            cost_estimate=pl.CostEstimate(
                flops=flops,
                transcendentals=M_p * H_p,
                bytes_accessed=bytes_accessed,
            ),
        )(x_p, w1_p, b1_p, w2_p, b2_p)

    return y_p[:M, :D_out].reshape(B, S, D_out)


if __name__ == "__main__":
    # Small shapes consistent with a ViT-style MLP block.
    B, S = 2, 8
    in_features, hidden_features, out_features = 32, 64, 32

    key = jax.random.PRNGKey(0)
    kx, k1, k2, k3, k4 = jax.random.split(key, 5)

    x = jax.random.normal(kx, (B, S, in_features), dtype=jnp.float32)
    # Deterministic parameter init (shapes follow nn.Linear, stored transposed).
    w1 = jax.random.normal(k1, (in_features, hidden_features), jnp.float32) * 0.1
    b1 = jax.random.normal(k2, (hidden_features,), jnp.float32) * 0.1
    w2 = jax.random.normal(k3, (hidden_features, out_features), jnp.float32) * 0.1
    b2 = jax.random.normal(k4, (out_features,), jnp.float32) * 0.1

    out = mlp_forward(x, w1, b1, w2, b2)
    jax.block_until_ready(out)

    # Reference in plain JAX f32 (exact-erf GELU, dropout p=0 is identity).
    # Tolerance is loosened because the kernel's matmuls run in bf16 (f32 acc).
    h_ref = x @ w1 + b1
    h_ref = 0.5 * h_ref * (1.0 + jax.lax.erf(h_ref / jnp.sqrt(2.0)))
    ref = h_ref @ w2 + b2
    assert out.shape == ref.shape
    assert jnp.allclose(out, ref, atol=2e-2, rtol=2e-2), "mismatch vs reference"

    print("KERNEL_OK")
</pallas_src>

<mosaic_0001>
module attributes {stable_mosaic.version = 11 : i64} {
  func.func @_mlp_kernel_resident(%arg0: i32, %arg1: memref<16x128xbf16, #tpu.memory_space<vmem>>, %arg2: memref<128x128xbf16, #tpu.memory_space<vmem>>, %arg3: memref<1x128xf32, #tpu.memory_space<vmem>>, %arg4: memref<128x128xbf16, #tpu.memory_space<vmem>>, %arg5: memref<1x128xf32, #tpu.memory_space<vmem>>, %arg6: memref<16x128xf32, #tpu.memory_space<vmem>>) attributes {dimension_semantics = [#tpu.dimension_semantics<parallel>], iteration_bounds = array<i64: 1>, scalar_prefetch = 0 : i64, scratch_operands = 0 : i64, tpu.core_type = #tpu.core_type<tc>, window_params = [{transform_indices = @transform_0, window_bounds = array<i64: 16, 128>}, {pipeline_mode = #tpu.pipeline_mode<synchronous>, transform_indices = @transform_1, window_bounds = array<i64: 128, 128>}, {pipeline_mode = #tpu.pipeline_mode<synchronous>, transform_indices = @transform_2, window_bounds = array<i64: 1, 128>}, {pipeline_mode = #tpu.pipeline_mode<synchronous>, transform_indices = @transform_3, window_bounds = array<i64: 128, 128>}, {pipeline_mode = #tpu.pipeline_mode<synchronous>, transform_indices = @transform_4, window_bounds = array<i64: 1, 128>}, {transform_indices = @transform_5, window_bounds = array<i64: 16, 128>}]} {
    %c0 = arith.constant 0 : index
    %c0_0 = arith.constant 0 : index
    %0 = vector.load %arg1[%c0, %c0_0] : memref<16x128xbf16, #tpu.memory_space<vmem>>, vector<16x128xbf16>
    %c0_1 = arith.constant 0 : index
    %c0_2 = arith.constant 0 : index
    %1 = vector.load %arg2[%c0_1, %c0_2] : memref<128x128xbf16, #tpu.memory_space<vmem>>, vector<128x128xbf16>
    %cst = arith.constant dense<0.000000e+00> : vector<16x128xf32>
    %2 = tpu.matmul %0, %1, %cst {dimension_numbers = #tpu.dot_dimension_numbers<[1], [0], [0], [1], [0, 0, 1, 1], [], []>} : vector<16x128xbf16>, vector<128x128xbf16>, vector<16x128xf32> -> vector<16x128xf32>
    %c0_3 = arith.constant 0 : index
    %c0_4 = arith.constant 0 : index
    %3 = vector.load %arg3[%c0_3, %c0_4] : memref<1x128xf32, #tpu.memory_space<vmem>>, vector<1x128xf32>
    %4 = vector.broadcast %3 : vector<1x128xf32> to vector<16x128xf32>
    %5 = arith.addf %2, %4 : vector<16x128xf32>
    %cst_5 = arith.constant 5.000000e-01 : f32
    %6 = vector.broadcast %cst_5 : f32 to vector<16x128xf32>
    %7 = arith.mulf %6, %5 : vector<16x128xf32>
    %cst_6 = arith.constant 0.707106769 : f32
    %8 = vector.broadcast %cst_6 : f32 to vector<16x128xf32>
    %9 = arith.mulf %5, %8 : vector<16x128xf32>
    %10 = math.erf %9 : vector<16x128xf32>
    %cst_7 = arith.constant 1.000000e+00 : f32
    %11 = vector.broadcast %cst_7 : f32 to vector<16x128xf32>
    %12 = arith.addf %11, %10 : vector<16x128xf32>
    %13 = arith.mulf %7, %12 : vector<16x128xf32>
    %14 = arith.truncf %13 : vector<16x128xf32> to vector<16x128xbf16>
    %c0_8 = arith.constant 0 : index
    %c0_9 = arith.constant 0 : index
    %15 = vector.load %arg4[%c0_8, %c0_9] : memref<128x128xbf16, #tpu.memory_space<vmem>>, vector<128x128xbf16>
    %cst_10 = arith.constant dense<0.000000e+00> : vector<16x128xf32>
    %16 = tpu.matmul %14, %15, %cst_10 {dimension_numbers = #tpu.dot_dimension_numbers<[1], [0], [0], [1], [0, 0, 1, 1], [], []>} : vector<16x128xbf16>, vector<128x128xbf16>, vector<16x128xf32> -> vector<16x128xf32>
    %c0_11 = arith.constant 0 : index
    %c0_12 = arith.constant 0 : index
    %17 = vector.load %arg5[%c0_11, %c0_12] : memref<1x128xf32, #tpu.memory_space<vmem>>, vector<1x128xf32>
    %18 = vector.broadcast %17 : vector<1x128xf32> to vector<16x128xf32>
    %19 = arith.addf %16, %18 : vector<16x128xf32>
    %c0_13 = arith.constant 0 : index
    %c0_14 = arith.constant 0 : index
    %20 = vector.load %arg6[%c0_13, %c0_14] : memref<16x128xf32, #tpu.memory_space<vmem>>, vector<16x128xf32>
    tpu.vector_store %arg6[%c0_13, %c0_14], %19 {strides = array<i32>} : memref<16x128xf32, #tpu.memory_space<vmem>>, vector<16x128xf32>,
    return
  }
  func.func @transform_0(%arg0: i32) -> (i32, i32) {
    %c0_i32 = arith.constant 0 : i32
    %c0_i32_0 = arith.constant 0 : i32
    return %arg0, %c0_i32 : i32, i32
  }
  func.func @transform_1(%arg0: i32) -> (i32, i32) {
    %c0_i32 = arith.constant 0 : i32
    %c0_i32_0 = arith.constant 0 : i32
    %c0_i32_1 = arith.constant 0 : i32
    return %c0_i32, %c0_i32_0 : i32, i32
  }
  func.func @transform_2(%arg0: i32) -> (i32, i32) {
    %c0_i32 = arith.constant 0 : i32
    %c0_i32_0 = arith.constant 0 : i32
    %c0_i32_1 = arith.constant 0 : i32
    return %c0_i32, %c0_i32_0 : i32, i32
  }
  func.func @transform_3(%arg0: i32) -> (i32, i32) {
    %c0_i32 = arith.constant 0 : i32
    %c0_i32_0 = arith.constant 0 : i32
    %c0_i32_1 = arith.constant 0 : i32
    return %c0_i32, %c0_i32_0 : i32, i32
  }
  func.func @transform_4(%arg0: i32) -> (i32, i32) {
    %c0_i32 = arith.constant 0 : i32
    %c0_i32_0 = arith.constant 0 : i32
    %c0_i32_1 = arith.constant 0 : i32
    return %c0_i32, %c0_i32_0 : i32, i32
  }
  func.func @transform_5(%arg0: i32) -> (i32, i32) {
    %c0_i32 = arith.constant 0 : i32
    %c0_i32_0 = arith.constant 0 : i32
    return %arg0, %c0_i32 : i32, i32
  }
}

</mosaic_0001>

<bundles_post_ra>
// kernel: tpu_custom_call.1
= control target key start
LH: loop header
LB: loop body
LE: loop exit
PB: predicated region body
PF: predicated region fallthrough
CT: control target
= control target key end

     0   :  { %10 = vsyncpa [#allocation3], 0  ;;  %s638_s0 = inlined_call_operand.hbm [shape: bf16[16,128], index: 0, kind: input, shape index: {}]   ;;  %s639_s1 = inlined_call_operand.hbm [shape: bf16[128,128], index: 1, kind: input, shape index: {}]   ;;  %s640_s2 = inlined_call_operand.vmem [shape: f32[1,128], index: 2, kind: input, shape index: {}]   ;;  %s641_s3 = inlined_call_operand.hbm [shape: bf16[128,128], index: 3, kind: input, shape index: {}]   ;;  %s642_s4 = inlined_call_operand.vmem [shape: f32[1,128], index: 4, kind: input, shape index: {}]   ;;  %s643_s5 = inlined_call_operand.hbm [shape: f32[16,128], index: 5, kind: output, shape index: {}]  }
   0x1   :  { %11 = vsyncpa [#allocation6], 0 }
   0x2   :  { %12 = vsyncpa [#allocation4], 0  ;;  %s528_s18 = smov [#allocation5]   ;;  %s529_s20 = smov [#allocation2]  }
   0x3   :  { %s30_s19 = sshll.u32 %s528_s18, 4  ;;  %s18_s21 = sshll.u32 %s529_s20, 4  ;;  %s31_s19 = int_to_ptr.vmem [resolvable:$true] %s30_s19  ;;  %s568_s21 = int_to_ptr.vmem [resolvable:$true] %s18_s21 }
   0x4   :  { %s434_s24 = scalar_lea.hbm %s639_s1, 1024 }
   0x5   :  { %p435_p0 = scmp.ne.s32.totalorder %s639_s1, %s434_s24  ;;  %p438_p1 = scmp.lt.u32.totalorder %s434_s24, %s639_s1 }
   0x7   :  { %p440_p2 = pnand %p438_p1, %p435_p0 }
   0x9   :  { %443 = shalt.err (!%p440_p2)
}
   0xa   :  { %s444_s29 = scalar_lea.vmem %s31_s19, 1024  ;;  %p449_p4 = scmp.lt.s32.totalorder %s31_s19, %s31_s19 }
   0xb   :  { %p445_p3 = scmp.ne.s32.totalorder %s31_s19, %s444_s29  ;;  %p450_p5 = scmp.lt.s32.totalorder %s444_s29, %s444_s29 }
   0xd   :  { %p451_p6 = por %p450_p5, %p449_p4 }
   0xf   :  { %p452_p7 = pnand %p451_p6, %p445_p3 }
  0x11   :  { %455 = shalt.err (!%p452_p7)
}
  0x12   :  { %s530_s30 = smov 64   ;;  %s531_s6 = smov 4  }
  0x13   :  { %36 = dma.hbm_to_vmem [thread:$0]  %s639_s1, 1024, %s31_s19, [#allocation6], %s530_s30, %s530_s30, %s531_s6  }
  0x14   :  { %s456_s11 = scalar_lea.hbm %s638_s0, 128 }
  0x15   :  { %p457_p8 = scmp.ne.s32.totalorder %s638_s0, %s456_s11  ;;  %p460_p9 = scmp.lt.u32.totalorder %s456_s11, %s638_s0 }
  0x17   :  { %p462_p10 = pnand %p460_p9, %p457_p8 }
  0x19   :  { %465 = shalt.err (!%p462_p10)
}
  0x1a   :  { %s466_s16 = scalar_lea.vmem %s568_s21, 128  ;;  %p471_p12 = scmp.lt.s32.totalorder %s568_s21, %s568_s21 }
  0x1b   :  { %p467_p11 = scmp.ne.s32.totalorder %s568_s21, %s466_s16  ;;  %p472_p13 = scmp.lt.s32.totalorder %s466_s16, %s466_s16 }
  0x1d   :  { %p473_p0 = por %p472_p13, %p471_p12 }
  0x1f   :  { %p474_p1 = pnand %p473_p0, %p467_p11 }
  0x21   :  { %477 = shalt.err (!%p474_p1)
}
  0x22   :  { %24 = dma.hbm_to_vmem [thread:$0]  %s638_s0, 128, %s568_s21, [#allocation3], %s530_s30, %s530_s30, %s531_s6  }
  0x23   :  { %s532_s18 = smov [#allocation7]   ;;  %s478_s23 = scalar_lea.hbm %s641_s3, 1024 }
  0x24   :  { %s44_s19 = sshll.u32 %s532_s18, 4  ;;  %p479_p2 = scmp.ne.s32.totalorder %s641_s3, %s478_s23  ;;  %s45_s19 = int_to_ptr.vmem [resolvable:$true] %s44_s19 }
  0x25   :  { %p482_p3 = scmp.lt.u32.totalorder %s478_s23, %s641_s3 }
  0x27   :  { %p484_p4 = pnand %p482_p3, %p479_p2 }
  0x29   :  { %487 = shalt.err (!%p484_p4)
}
  0x2a   :  { %s488_s28 = scalar_lea.vmem %s45_s19, 1024  ;;  %p493_p6 = scmp.lt.s32.totalorder %s45_s19, %s45_s19 }
  0x2b   :  { %p489_p5 = scmp.ne.s32.totalorder %s45_s19, %s488_s28  ;;  %p494_p7 = scmp.lt.s32.totalorder %s488_s28, %s488_s28 }
  0x2d   :  { %p495_p8 = por %p494_p7, %p493_p6 }
  0x2f   :  { %p496_p9 = pnand %p495_p8, %p489_p5 }
  0x31   :  { %499 = shalt.err (!%p496_p9)
}
  0x32   :  { %50 = dma.hbm_to_vmem [thread:$0]  %s641_s3, 1024, %s45_s19, [#allocation6], %s530_s30, %s530_s30, %s531_s6  }
  0x33   :  { %522 = dma.done.wait [#allocation3], 128  }
  0x34   :  { %523 = vsyncadd [#allocation3], 4294967168 }
  0x35   :  { %524 = dma.done.wait [#allocation6], 2048  }
  0x36   :  { %525 = vsyncadd [#allocation6], 4294965248  ;;  %v533_v0 = vmov 0.0   ;;  %vm534_vm0 = vmmov 0   ;;  %v413_v1 = vld [vmem:[#allocation5] sm:$0xff]   ;;  %v414_v2 = vld [vmem:[#allocation5 + $0x8] sm:$0xff]  }
  0x37   :  { %363 = vmatprep.subr.bf16.mxu0 %v533_v0  ;;  %379 = vmatprep.mubr.msk.bf16.mxu0 %vm534_vm0, %v533_v0  ;;  %v415_v3 = vld [vmem:[#allocation5 + $0x10] sm:$0xff]   ;;  %v422_v4 = vld [vmem:[#allocation7] sm:$0xff]   ;;  %v416_v5 = vld [vmem:[#allocation5 + $0x18] sm:$0xff]   ;;  %s535_s6 = smov [#allocation8]  }
  0x38   :  { %383 = vmatprep.subr.bf16.mxu1 %v533_v0  ;;  %399 = vmatprep.mubr.msk.bf16.mxu1 %vm534_vm0, %v533_v0  ;;  %v423_v6 = vld [vmem:[#allocation7 + $0x8] sm:$0xff]   ;;  %v417_v7 = vld [vmem:[#allocation5 + $0x20] sm:$0xff]   ;;  %v419_v9 = vld [vmem:[#allocation5 + $0x30] sm:$0xff]   ;;  %s313_s7 = sshll.u32 %s535_s6, 4  ;;  %s314_s7 = int_to_ptr.vmem [resolvable:$true] %s313_s7 }
  0x39   :  { %364 = vmatpush3.bf16.msra.mxu0 %v413_v1  ;;  %384 = vmatpush3.bf16.msra.mxu1 %v422_v4  ;;  %v418_v8 = vld [vmem:[#allocation5 + $0x28] sm:$0xff]   ;;  %v420_v10 = vld [vmem:[#allocation5 + $0x38] sm:$0xff]   ;;  %v424_v12 = vld [vmem:[#allocation7 + $0x10] sm:$0xff]   ;;  %s500_s8 = scalar_lea.vmem %s314_s7, 256  ;;  %p505_p11 = scmp.lt.s32.totalorder %s314_s7, %s314_s7 }
  0x3a   :  { %365 = vmatprep.subr.bf16.mxu0 %v533_v0  ;;  %385 = vmatprep.subr.bf16.mxu1 %v533_v0  ;;  %v421_v11 = vld [vmem:[#allocation2] sm:$0xff]   ;;  %v426_v14 = vld [vmem:[#allocation7 + $0x20] sm:$0xff]   ;;  %v427_v15 = vld [vmem:[#allocation7 + $0x28] sm:$0xff]   ;;  %p501_p10 = scmp.ne.s32.totalorder %s314_s7, %s500_s8  ;;  %p506_p12 = scmp.lt.s32.totalorder %s500_s8, %s500_s8 }
  0x3b   :  { %v425_v13 = vld [vmem:[#allocation7 + $0x18] sm:$0xff]   ;;  %v428_v16 = vld [vmem:[#allocation7 + $0x30] sm:$0xff]  }
  0x3c   :  { %v429_v17 = vld [vmem:[#allocation7 + $0x38] sm:$0xff]   ;;  %p507_p13 = por %p506_p12, %p505_p11 }
  0x3d   :  { %366 = vmatpush3.bf16.msra.mxu0 %v414_v2  ;;  %386 = vmatpush3.bf16.msra.mxu1 %v423_v6  ;;  %v326_v18 = vld [vmem:[%s640_s2] ss:$0 sm:$0xff] }
  0x3e   :  { %367 = vmatprep.subr.bf16.mxu0 %v533_v0  ;;  %387 = vmatprep.subr.bf16.mxu1 %v533_v0  ;;  %v336_v36 = vld [vmem:[%s642_s4] ss:$0 sm:$0xff]  ;;  %p508_p0 = pnand %p507_p13, %p501_p10 }
  0x41   :  { %368 = vmatpush3.bf16.msra.mxu0 %v415_v3  ;;  %388 = vmatpush3.bf16.msra.mxu1 %v424_v12 }
  0x42   :  { %369 = vmatprep.subr.bf16.mxu0 %v533_v0  ;;  %389 = vmatprep.subr.bf16.mxu1 %v533_v0 }
  0x45   :  { %370 = vmatpush3.bf16.msra.mxu0 %v416_v5  ;;  %390 = vmatpush3.bf16.msra.mxu1 %v425_v13 }
  0x46   :  { %371 = vmatprep.subr.bf16.mxu0 %v533_v0  ;;  %391 = vmatprep.subr.bf16.mxu1 %v533_v0 }
  0x49   :  { %372 = vmatpush3.bf16.msra.mxu0 %v417_v7  ;;  %392 = vmatpush3.bf16.msra.mxu1 %v426_v14 }
  0x4a   :  { %373 = vmatprep.subr.bf16.mxu0 %v533_v0  ;;  %393 = vmatprep.subr.bf16.mxu1 %v533_v0 }
  0x4d   :  { %374 = vmatpush3.bf16.msra.mxu0 %v418_v8  ;;  %394 = vmatpush3.bf16.msra.mxu1 %v427_v15 }
  0x4e   :  { %375 = vmatprep.subr.bf16.mxu0 %v533_v0  ;;  %395 = vmatprep.subr.bf16.mxu1 %v533_v0 }
  0x51   :  { %376 = vmatpush3.bf16.msra.mxu0 %v419_v9  ;;  %396 = vmatpush3.bf16.msra.mxu1 %v428_v16 }
  0x52   :  { %377 = vmatprep.subr.bf16.mxu0 %v533_v0  ;;  %397 = vmatprep.subr.bf16.mxu1 %v533_v0 }
  0x55   :  { %378 = vmatpush3.bf16.msra.mxu0 %v420_v10  ;;  %398 = vmatpush3.bf16.msra.mxu1 %v429_v17 }
  0x58   :  { %380 = vmatmul.mubr.bf16.vlgmr.msra.gmra.mrb[0].mxu0 %v421_v11 }
 0x12b   :  { %v176_v19 = vpop.f32.mrb[0].mxu0 }
 0x12c   :  { %v177_v20 = vadd.f32 %v326_v18, %v176_v19  ;;  %v381_v21 = vpop.f32.mrb[1].mxu0 }
 0x12d   :  { %v179_v22 = vpop.f32.mrb[2].mxu0 }
 0x12e   :  { %v185_v23 = vmul.f32 0.70710677, %v177_v20  ;;  %v180_v24 = vadd.f32 %v326_v18, %v179_v22  ;;  %v382_v25 = vpop.f32.mrb[3].mxu0  ;;  %v183_v30 = vmul.f32 0.5, %v177_v20 }
 0x130   :  { %430 = verf.f32 %v185_v23  ;;  %v186_v26 = vmul.f32 0.70710677, %v180_v24  ;;  %v184_v31 = vmul.f32 0.5, %v180_v24 }
 0x132   :  { %432 = verf.f32 %v186_v26 }
 0x13a   :  { %v431_v27 = vpop.eup %430 }
 0x13b   :  { %v189_v28 = vadd.f32 1.0, %v431_v27 }
 0x13c   :  { %v433_v29 = vpop.eup %432 }
 0x13d   :  { %v190_v32 = vadd.f32 1.0, %v433_v29  ;;  %v191_v33 = vmul.f32 %v189_v28, %v183_v30 }
 0x13f   :  { %v192_v34 = vmul.f32 %v190_v32, %v184_v31 }
 0x141   :  { %v193_v35 = vpack.c.bf16 %v192_v34, %v191_v33 }
 0x143   :  { %400 = vmatmul.mubr.bf16.vlgmr.msra.gmra.mrb[0].mxu1 %v193_v35 }
 0x216   :  { %v299_v37 = vpop.f32.mrb[0].mxu1 }
 0x217   :  { %v300_v38 = vadd.f32 %v336_v36, %v299_v37  ;;  %v401_v39 = vpop.f32.mrb[1].mxu1 }
 0x218   :  { %v302_v40 = vpop.f32.mrb[2].mxu1 }
 0x219   :  { %306 = vst [vmem:[#allocation8] sm:$0xff] %v300_v38  ;;  %v303_v41 = vadd.f32 %v336_v36, %v302_v40  ;;  %v402_v42 = vpop.f32.mrb[3].mxu1 }
 0x21b   :  { %307 = vst [vmem:[#allocation8 + $0x8] sm:$0xff] %v303_v41 }
 0x21c   :  { %511 = shalt.err (!%p508_p0)
}
 0x21d   :  { %s512_s10 = scalar_lea.hbm %s643_s5, 256 }
 0x21e   :  { %p513_p1 = scmp.ne.s32.totalorder %s643_s5, %s512_s10  ;;  %p516_p2 = scmp.lt.u32.totalorder %s512_s10, %s643_s5 }
 0x220   :  { %p518_p3 = pnand %p516_p2, %p513_p1 }
 0x222   :  { %521 = shalt.err (!%p518_p3)
}
 0x223   :  { %s536_s15 = smov 128   ;;  %s537_s16 = smov 8  }
 0x224   :  { %319 = dma.vmem_to_hbm [thread:$0]  %s314_s7, 256, %s643_s5, [#allocation4], %s536_s15, %s536_s15, %s537_s16  }
 0x225   :  { %526 = dma.done.wait [#allocation4], 256  }
 0x226   :  { %527 = vsyncadd [#allocation4], 4294967040 }
 0x227   :  { %323 = vsyncpa [#allocation3], 1 }
 0x228   :  { %324 = vsyncpa [#allocation6], 1 }
 0x229   :  { %325 = vsyncpa [#allocation4], 1 }

</bundles_post_ra>
